<compile_context>
chip_gen: v7x
topology: tpu7x:2x2x1
jax: 0.10.0
libtpu: 0.0.40
codegen_flags: <defaults>
</compile_context>

<pallas_src>
import math
import functools

import numpy as np
import jax
import jax.numpy as jnp
from jax.experimental import pallas as pl
from jax.experimental.pallas import tpu as pltpu

_HIGHEST = jax.lax.Precision.HIGHEST   # full-f32 MXU contraction


# --------------------------------------------------------------------------- #
# Pallas kernel 1: 3x3 same-padding convolution as a single fused MXU matmul.
# --------------------------------------------------------------------------- #
def _conv_mm_kernel(p_ref, w_ref, b_ref, o_ref):
    # p_ref: (9*Cin, THW) im2col patches | w_ref: (Cout, 9*Cin) | b_ref: (Cout, 1)
    # o_ref: (Cout, THW)  -- spatial on lanes => lane-dense stores.
    o_ref[...] = (
        jnp.dot(w_ref[...], p_ref[...],
                preferred_element_type=jnp.float32, precision=_HIGHEST)
        + b_ref[...]
    )


def _im2col_nchw(x_nchw):
    """(N, Cin, H, W) -> (N, 9*Cin, H*W) patches, tap-major / channel-minor."""
    N, Cin, H, W = x_nchw.shape
    xp = jnp.pad(x_nchw, ((0, 0), (0, 0), (1, 1), (1, 1)))
    cols = []
    for dy in range(3):
        for dx in range(3):
            cols.append(xp[:, :, dy:dy + H, dx:dx + W].reshape(N, Cin, H * W))
    return jnp.concatenate(cols, axis=1)


def conv3x3_pallas(x_nchw, w_oihw, b, thw=512):
    """3x3 conv, padding=1, stride=1. x:(N,Cin,H,W), w:(Cout,Cin,3,3), b:(Cout,).

    Returns (N, Cout, H, W) float32.
    """
    # TODO(synk): for very large images add a row-tile grid axis with a 1-row halo
    # and fuse the srnet/adapt convs into one kernel (in-kernel im2col) to bound
    # the per-step VMEM footprint; unnecessary at the sizes exercised here.
    N, Cin, H, W = x_nchw.shape
    Cout = w_oihw.shape[0]
    HW = H * W

    patches = _im2col_nchw(x_nchw.astype(jnp.float32))                 # (N,9Cin,HW)
    # w_mat[o, (dy*3+dx)*Cin + c] = w[o, c, dy, dx]  (matches im2col ordering)
    w_mat = jnp.transpose(w_oihw, (0, 2, 3, 1)).reshape(Cout, 9 * Cin)
    w_mat = w_mat.astype(jnp.float32)
    b2 = b.reshape(Cout, 1).astype(jnp.float32)

    t = HW if HW <= 2 * thw else thw            # one tile for small images
    HWp = pl.cdiv(HW, t) * t
    if HWp != HW:
        patches = jnp.pad(patches, ((0, 0), (0, 0), (0, HWp - HW)))

    out = pl.pallas_call(
        _conv_mm_kernel,
        out_shape=jax.ShapeDtypeStruct((N, Cout, HWp), jnp.float32),
        grid=(N, HWp // t),
        in_specs=[
            pl.BlockSpec((None, 9 * Cin, t), lambda n, j: (n, 0, j)),
            pl.BlockSpec((Cout, 9 * Cin), lambda n, j: (0, 0)),
            pl.BlockSpec((Cout, 1), lambda n, j: (0, 0)),
        ],
        out_specs=pl.BlockSpec((None, Cout, t), lambda n, j: (n, 0, j)),
        compiler_params=pltpu.CompilerParams(
            dimension_semantics=("parallel", "parallel")),
    )(patches, w_mat, b2)
    return out[:, :, :HW].reshape(N, Cout, H, W)


# --------------------------------------------------------------------------- #
# OPE render helpers (shared by both render kernels).
# --------------------------------------------------------------------------- #
def _ope_embed(t, max_freq, omega):
    """t: (1, TQ) -> (2*max_freq+1, TQ).

    Harmonics built with the angle-addition recurrence: 2 transcendentals per
    axis per sample instead of 2*max_freq (EUP pressure relief)."""
    sqrt2 = math.sqrt(2.0)
    wt = omega * t
    c1, s1 = jnp.cos(wt), jnp.sin(wt)
    parts = [jnp.ones_like(t)]
    ck, sk = c1, s1
    for f in range(1, max_freq + 1):
        parts.append(sqrt2 * ck)
        parts.append(sqrt2 * sk)
        if f < max_freq:
            ck, sk = ck * c1 - sk * s1, sk * c1 + ck * s1
    return jnp.concatenate(parts, axis=0)


def _sample_pred(relx, rely, lat, max_freq, omega, C):
    """relx/rely: (1, TQ); lat: (3C, TQ).  Returns pred (3, TQ), area (1, TQ)."""
    K = 2 * max_freq + 1
    X = _ope_embed(relx, max_freq, omega)                      # (K, TQ)
    Y = _ope_embed(rely, max_freq, omega)                      # (K, TQ)
    # ope[i*K+j] = X[i]*Y[j]  (matches torch X^T @ Y then .view(..., -1))
    ope = (X[:, None, :] * Y[None, :, :]).reshape(K * K, relx.shape[-1])
    chans = [jnp.sum(ope * lat[c * C:(c + 1) * C, :], axis=0, keepdims=True)
             for c in range(3)]
    pred = jnp.concatenate(chans, axis=0)                      # (3, TQ)
    area = jnp.abs(relx * rely) + 1e-9
    return pred, area


def _blend_store(preds, areas, o_ref):
    tot = areas[0] + areas[1] + areas[2] + areas[3]
    inv_tot = pl.reciprocal(tot)       # 1 EUP reciprocal + 4 muls, not 4 divides
    perm = (3, 2, 1, 0)                # local ensemble: swap 0<->3, 1<->2
    out = preds[0] * (areas[perm[0]] * inv_tot)
    for s in range(1, 4):
        out = out + preds[s] * (areas[perm[s]] * inv_tot)
    o_ref[...] = out


# --------------------------------------------------------------------------- #
# Pallas kernel 2a: OPE render with IN-KERNEL nearest gather (one-hot matmul
# against the VMEM-resident feature map).  No HBM latent, no XLA transpose.
# --------------------------------------------------------------------------- #
def _render_gather_kernel(rel_ref, idx_ref, feat_ref, o_ref, *, max_freq, omega, C):
    # rel_ref: (4, 2, TQ)   rel_ref[s,0]=rel along H, rel_ref[s,1]=rel along W
    # idx_ref: (4, 1, TQ)   int32 flat nearest-pixel index into H*W
    # feat_ref:(3C, HW)     full per-image feature map (stays resident across q)
    # o_ref:   (3, TQ)
    HW = feat_ref.shape[-1]
    TQ = o_ref.shape[-1]
    feat = feat_ref[...]
    hw_iota = jax.lax.broadcasted_iota(jnp.int32, (HW, TQ), 0)
    preds, areas = [], []
    for s in range(4):
        onehot = jnp.where(hw_iota == idx_ref[s], 1.0, 0.0)            # (HW, TQ)
        lat = jnp.dot(feat, onehot,
                      preferred_element_type=jnp.float32, precision=_HIGHEST)
        p, a = _sample_pred(rel_ref[s, 0:1, :], rel_ref[s, 1:2, :],
                            lat, max_freq, omega, C)
        preds.append(p)
        areas.append(a)
    _blend_store(preds, areas, o_ref)


# --------------------------------------------------------------------------- #
# Pallas kernel 2b: render consuming a pre-gathered latent (fallback for large
# feature maps where the one-hot matmul would cost more than the HBM stream).
# --------------------------------------------------------------------------- #
def _render_latent_kernel(rel_ref, lat_ref, o_ref, *, max_freq, omega, C):
    # rel_ref: (4, 2, TQ), lat_ref: (4, 3C, TQ), o_ref: (3, TQ)
    preds, areas = [], []
    for s in range(4):
        p, a = _sample_pred(rel_ref[s, 0:1, :], rel_ref[s, 1:2, :],
                            lat_ref[s], max_freq, omega, C)
        preds.append(p)
        areas.append(a)
    _blend_store(preds, areas, o_ref)


# --------------------------------------------------------------------------- #
# Thin JAX glue: analytic F.grid_sample(mode='nearest', align_corners=False).
# --------------------------------------------------------------------------- #
def _nearest_indices(coord, H, W, eps=1e-6):
    """Index / rel_coord math for the 4 local-ensemble shifts.

    Returns rel (4,N,2,Q) f32 (already scaled by H/W) and idx (4,N,1,Q) int32.
    coord[...,0] indexes the H axis, coord[...,1] the W axis (this matches the
    .flip(-1) the PyTorch module applies before grid_sample).
    jnp.round is half-to-even; exact .5 ties are measure-zero thanks to the
    1e-6 shift but could in principle differ from some PyTorch backends.
    TODO(synk): cross-check tie rounding against torch.nn.functional.grid_sample.
    """
    rx, ry = 1.0 / H, 1.0 / W
    rels, idxs = [], []
    for vx in (-1.0, 1.0):
        for vy in (-1.0, 1.0):
            cx = jnp.clip(coord[:, :, 0] + vx * rx + eps, -1 + 1e-6, 1 - 1e-6)
            cy = jnp.clip(coord[:, :, 1] + vy * ry + eps, -1 + 1e-6, 1 - 1e-6)
            iy = jnp.clip(jnp.round((cx + 1.0) * H / 2.0 - 0.5), 0, H - 1).astype(jnp.int32)
            ix = jnp.clip(jnp.round((cy + 1.0) * W / 2.0 - 0.5), 0, W - 1).astype(jnp.int32)
            qx = -1.0 + (2.0 * iy.astype(jnp.float32) + 1.0) / H
            qy = -1.0 + (2.0 * ix.astype(jnp.float32) + 1.0) / W
            relx = (coord[:, :, 0] - qx) * H
            rely = (coord[:, :, 1] - qy) * W
            rels.append(jnp.stack([relx, rely], axis=1))               # (N, 2, Q)
            idxs.append((iy * W + ix)[:, None, :])                     # (N, 1, Q)
    return jnp.stack(rels, axis=0), jnp.stack(idxs, axis=0)


def query_rgb_pallas(feat_chw, coord, max_freq, omega, tq=512,
                     gather_in_kernel=None, gather_hw_threshold=1024):
    """OPE_render_intp.query_rgb for one chunk of coords.

    feat_chw: (N, 3C, H, W) f32, coord: (N, Q, 2) in [-1, 1].  Returns (N, Q, 3).
    """
    N, C3, H, W = feat_chw.shape
    C = C3 // 3
    HW = H * W
    Q = coord.shape[1]
    coord = coord.astype(jnp.float32)
    feat_flat = feat_chw.reshape(N, C3, HW).astype(jnp.float32)

    rel, idx = _nearest_indices(coord, H, W)

    tq = max(128, (tq // 128) * 128)
    Qp = pl.cdiv(Q, tq) * tq
    if Qp != Q:
        # Padded tail: rel=1 / idx=0 keep areas O(1) and everything finite even
        # without the 1e-9 epsilon; the tail is sliced off below.
        rel = jnp.pad(rel, ((0, 0), (0, 0), (0, 0), (0, Qp - Q)), constant_values=1.0)
        idx = jnp.pad(idx, ((0, 0), (0, 0), (0, 0), (0, Qp - Q)))

    if gather_in_kernel is None:
        gather_in_kernel = HW <= gather_hw_threshold

    if gather_in_kernel:
        kernel = functools.partial(_render_gather_kernel,
                                   max_freq=max_freq, omega=omega, C=C)
        out = pl.pallas_call(
            kernel,
            out_shape=jax.ShapeDtypeStruct((N, 3, Qp), jnp.float32),
            grid=(N, Qp // tq),
            in_specs=[
                pl.BlockSpec((4, None, 2, tq), lambda n, q: (0, n, 0, q)),
                pl.BlockSpec((4, None, 1, tq), lambda n, q: (0, n, 0, q)),
                # feature block depends only on n -> fetched once per image,
                # revisited across the q tiles.
                pl.BlockSpec((None, C3, HW), lambda n, q: (n, 0, 0)),
            ],
            out_specs=pl.BlockSpec((None, 3, tq), lambda n, q: (n, 0, q)),
            compiler_params=pltpu.CompilerParams(
                dimension_semantics=("parallel", "arbitrary")),
        )(rel, idx, feat_flat)
    else:
        # Large feature map: gather in XLA, directly into the lane-dense
        # (3C, Q) layout (no separate transpose pass).
        lat = jnp.stack(
            [jnp.take_along_axis(feat_flat, idx[s], axis=2) for s in range(4)],
            axis=0)                                                    # (4,N,3C,Qp)
        kernel = functools.partial(_render_latent_kernel,
                                   max_freq=max_freq, omega=omega, C=C)
        out = pl.pallas_call(
            kernel,
            out_shape=jax.ShapeDtypeStruct((N, 3, Qp), jnp.float32),
            grid=(N, Qp // tq),
            in_specs=[
                pl.BlockSpec((4, None, 2, tq), lambda n, q: (0, n, 0, q)),
                pl.BlockSpec((4, None, C3, tq), lambda n, q: (0, n, 0, q)),
            ],
            out_specs=pl.BlockSpec((None, 3, tq), lambda n, q: (n, 0, q)),
            compiler_params=pltpu.CompilerParams(
                dimension_semantics=("parallel", "arbitrary")),
        )(rel, lat)

    return jnp.transpose(out[:, :, :Q], (0, 2, 1))                     # (N, Q, 3)


# --------------------------------------------------------------------------- #
# Full OPE_net_adapt.forward
# --------------------------------------------------------------------------- #
def ope_net_adapt_forward(params, img_lr_nchw, sample_coords, max_freq,
                          bsize=30000, tq=512):
    """img_lr: (N,3,H,W), sample_coords: (N,Q,2) in [-1,1].  Returns (N,Q,3)."""
    omega = 0.5 * math.pi
    x = img_lr_nchw.astype(jnp.float32)

    # TODO(synk): the real srnet comes from models.make(srnet_spec) (external);
    # replaced with a deterministic stand-in single 3x3 conv producing out_dim
    # channels.
    feat = conv3x3_pallas(x, params["srnet_w"], params["srnet_b"])        # (N,D,H,W)

    # adapt_R / adapt_G / adapt_B concatenated along output channels == one conv.
    feat3c = conv3x3_pallas(feat, params["adapt_w"], params["adapt_b"])   # (N,3C,H,W)

    Q = sample_coords.shape[1]
    preds, ql = [], 0
    while ql < Q:    # batched_predict chunking (per-query independent)
        qr = min(ql + bsize, Q)
        preds.append(query_rgb_pallas(feat3c, sample_coords[:, ql:qr, :],
                                      max_freq, omega, tq=tq))
        ql = qr
    return jnp.concatenate(preds, axis=1)


# --------------------------------------------------------------------------- #
# Pure-JAX references (verification only)
# --------------------------------------------------------------------------- #
def conv3x3_ref(x_nchw, w_oihw, b):
    out = jax.lax.conv_general_dilated(
        x_nchw.astype(jnp.float32), w_oihw.astype(jnp.float32),
        window_strides=(1, 1), padding="SAME",
        dimension_numbers=("NCHW", "OIHW", "NCHW"), precision=_HIGHEST)
    return out + b.astype(jnp.float32)[None, :, None, None]


def render_ref(feat_chw, coord, max_freq, omega):
    N, C3, H, W = feat_chw.shape
    C = C3 // 3
    K = 2 * max_freq + 1
    feat_flat = feat_chw.reshape(N, C3, H * W)
    rel, idx = _nearest_indices(coord.astype(jnp.float32), H, W)
    preds, areas = [], []
    for s in range(4):
        lat = jnp.take_along_axis(feat_flat, idx[s], axis=2)             # (N,3C,Q)
        relx, rely = rel[s, :, 0, :], rel[s, :, 1, :]                    # (N,Q)

        def emb(t):
            parts = [jnp.ones_like(t)]
            for f in range(1, max_freq + 1):
                parts.append(math.sqrt(2.0) * jnp.cos(omega * f * t))
                parts.append(math.sqrt(2.0) * jnp.sin(omega * f * t))
            return jnp.stack(parts, axis=-1)                             # (N,Q,K)

        X, Y = emb(relx), emb(rely)
        ope = (X[..., :, None] * Y[..., None, :]).reshape(N, -1, K * K)  # (N,Q,C)
        latq = jnp.transpose(lat, (0, 2, 1))                             # (N,Q,3C)
        pred = jnp.stack([jnp.sum(ope * latq[..., c * C:(c + 1) * C], axis=-1)
                          for c in range(3)], axis=-1)                   # (N,Q,3)
        preds.append(pred)
        areas.append(jnp.abs(relx * rely) + 1e-9)
    tot = areas[0] + areas[1] + areas[2] + areas[3]
    perm = (3, 2, 1, 0)
    ret = 0.0
    for s in range(4):
        ret = ret + preds[s] * (areas[perm[s]] / tot)[..., None]
    return ret


# --------------------------------------------------------------------------- #
if __name__ == "__main__":
    max_freq = 2
    C = (2 * max_freq + 1) ** 2          # 25
    out_dim = 16                         # stand-in srnet.out_dim
    N, H, W = 2, 8, 8
    Q = 300
    omega = 0.5 * math.pi

    key = jax.random.PRNGKey(0)
    k1, k2, k3, k4, k5, k6 = jax.random.split(key, 6)
    img_lr = jax.random.normal(k1, (N, 3, H, W), jnp.float32)
    sample_coords = jax.random.uniform(k2, (N, Q, 2), jnp.float32, -1.0, 1.0)

    params = {
        "srnet_w": jax.random.normal(k3, (out_dim, 3, 3, 3), jnp.float32) / math.sqrt(3 * 9),
        "srnet_b": 0.01 * jax.random.normal(k4, (out_dim,), jnp.float32),
        "adapt_w": jax.random.normal(k5, (3 * C, out_dim, 3, 3), jnp.float32) / math.sqrt(out_dim * 9),
        "adapt_b": 0.01 * jax.random.normal(k6, (3 * C,), jnp.float32),
    }

    out = ope_net_adapt_forward(params, img_lr, sample_coords, max_freq, bsize=150)
    out = jax.block_until_ready(out)
    assert out.shape == (N, Q, 3)
    assert bool(jnp.all(jnp.isfinite(out)))

    # --- verification ------------------------------------------------------ #
    # conv kernels (tight f32 tolerance; full-precision MXU contraction)
    feat_p = jax.block_until_ready(
        conv3x3_pallas(img_lr, params["srnet_w"], params["srnet_b"]))
    feat_r = conv3x3_ref(img_lr, params["srnet_w"], params["srnet_b"])
    np.testing.assert_allclose(np.asarray(feat_p), np.asarray(feat_r),
                               rtol=1e-4, atol=1e-4)

    feat3c_p = jax.block_until_ready(
        conv3x3_pallas(feat_r, params["adapt_w"], params["adapt_b"]))
    feat3c_r = conv3x3_ref(feat_r, params["adapt_w"], params["adapt_b"])
    np.testing.assert_allclose(np.asarray(feat3c_p), np.asarray(feat3c_r),
                               rtol=1e-4, atol=1e-4)

    # render: in-kernel one-hot gather path and XLA-gather fallback path
    rend_r = render_ref(feat3c_r, sample_coords, max_freq, omega)
    rend_g = jax.block_until_ready(
        query_rgb_pallas(feat3c_r, sample_coords, max_freq, omega,
                         gather_in_kernel=True))
    np.testing.assert_allclose(np.asarray(rend_g), np.asarray(rend_r),
                               rtol=1e-3, atol=1e-3)
    rend_l = jax.block_until_ready(
        query_rgb_pallas(feat3c_r, sample_coords, max_freq, omega, tq=256,
                         gather_in_kernel=False))
    np.testing.assert_allclose(np.asarray(rend_l), np.asarray(rend_r),
                               rtol=1e-3, atol=1e-3)

    # end-to-end forward (Pallas conv chain + Pallas render) vs pure-JAX chain
    np.testing.assert_allclose(np.asarray(out), np.asarray(rend_r),
                               rtol=2e-3, atol=2e-3)

    print("KERNEL_OK")
</pallas_src>

<mosaic_0001>
module attributes {stable_mosaic.version = 11 : i64} {
  func.func @_conv_mm_kernel(%arg0: i32, %arg1: i32, %arg2: memref<1x27x64xf32, #tpu.memory_space<vmem>>, %arg3: memref<16x27xf32, #tpu.memory_space<vmem>>, %arg4: memref<16x1xf32, #tpu.memory_space<vmem>>, %arg5: memref<1x16x64xf32, #tpu.memory_space<vmem>>) attributes {dimension_semantics = [#tpu.dimension_semantics<parallel>, #tpu.dimension_semantics<parallel>], iteration_bounds = array<i64: 2, 1>, scalar_prefetch = 0 : i64, scratch_operands = 0 : i64, tpu.core_type = #tpu.core_type<tc>, window_params = [{transform_indices = @transform_0, window_bounds = array<i64: 1, 27, 64>}, {pipeline_mode = #tpu.pipeline_mode<synchronous>, transform_indices = @transform_1, window_bounds = array<i64: 16, 27>}, {pipeline_mode = #tpu.pipeline_mode<synchronous>, transform_indices = @transform_2, window_bounds = array<i64: 16, 1>}, {transform_indices = @transform_3, window_bounds = array<i64: 1, 16, 64>}]} {
    %c0 = arith.constant 0 : index
    %c0_0 = arith.constant 0 : index
    %0 = vector.load %arg3[%c0, %c0_0] : memref<16x27xf32, #tpu.memory_space<vmem>>, vector<16x27xf32>
    %c0_1 = arith.constant 0 : index
    %c0_2 = arith.constant 0 : index
    %c0_3 = arith.constant 0 : index
    %1 = vector.load %arg2[%c0_1, %c0_2, %c0_3] : memref<1x27x64xf32, #tpu.memory_space<vmem>>, vector<1x27x64xf32>
    %2 = vector.shape_cast %1 : vector<1x27x64xf32> to vector<27x64xf32>
    %cst = arith.constant dense<0.000000e+00> : vector<16x64xf32>
    %3 = tpu.matmul %0, %2, %cst {dimension_numbers = #tpu.dot_dimension_numbers<[1], [0], [0], [1], [0, 0, 1, 1], [], []>, precision = #tpu.contract_precision<fp32>} : vector<16x27xf32>, vector<27x64xf32>, vector<16x64xf32> -> vector<16x64xf32>
    %c0_4 = arith.constant 0 : index
    %c0_5 = arith.constant 0 : index
    %4 = vector.load %arg4[%c0_4, %c0_5] : memref<16x1xf32, #tpu.memory_space<vmem>>, vector<16x1xf32>
    %5 = vector.broadcast %4 : vector<16x1xf32> to vector<16x64xf32>
    %6 = arith.addf %3, %5 : vector<16x64xf32>
    %c0_6 = arith.constant 0 : index
    %c0_7 = arith.constant 0 : index
    %c0_8 = arith.constant 0 : index
    %7 = vector.load %arg5[%c0_6, %c0_7, %c0_8] : memref<1x16x64xf32, #tpu.memory_space<vmem>>, vector<1x16x64xf32>
    %8 = vector.shape_cast %7 : vector<1x16x64xf32> to vector<16x64xf32>
    %9 = vector.shape_cast %6 : vector<16x64xf32> to vector<1x16x64xf32>
    tpu.vector_store %arg5[%c0_6, %c0_7, %c0_8], %9 {strides = array<i32>} : memref<1x16x64xf32, #tpu.memory_space<vmem>>, vector<1x16x64xf32>,
    return
  }
  func.func @transform_0(%arg0: i32, %arg1: i32) -> (i32, i32, i32) {
    %c0_i32 = arith.constant 0 : i32
    %c0_i32_0 = arith.constant 0 : i32
    return %arg0, %c0_i32, %arg1 : i32, i32, i32
  }
  func.func @transform_1(%arg0: i32, %arg1: i32) -> (i32, i32) {
    %c0_i32 = arith.constant 0 : i32
    %c0_i32_0 = arith.constant 0 : i32
    %c0_i32_1 = arith.constant 0 : i32
    return %c0_i32, %c0_i32_0 : i32, i32
  }
  func.func @transform_2(%arg0: i32, %arg1: i32) -> (i32, i32) {
    %c0_i32 = arith.constant 0 : i32
    %c0_i32_0 = arith.constant 0 : i32
    %c0_i32_1 = arith.constant 0 : i32
    return %c0_i32, %c0_i32_0 : i32, i32
  }
  func.func @transform_3(%arg0: i32, %arg1: i32) -> (i32, i32, i32) {
    %c0_i32 = arith.constant 0 : i32
    %c0_i32_0 = arith.constant 0 : i32
    return %arg0, %c0_i32, %arg1 : i32, i32, i32
  }
}

</mosaic_0001>

<bundles_post_ra>
// kernel: tpu_custom_call.1
= control target key start
LH: loop header
LB: loop body
LE: loop exit
PB: predicated region body
PF: predicated region fallthrough
CT: control target
= control target key end

     0   :  { %8 = vsyncpa [#allocation3], 0  ;;  %s1336_s0 = inlined_call_operand.vmem [shape: f32[2,27,64], index: 0, kind: input, shape index: {}]   ;;  %s1337_s1 = inlined_call_operand.vmem [shape: f32[16,27], index: 1, kind: input, shape index: {}]   ;;  %s1338_s2 = inlined_call_operand.vmem [shape: f32[16,1], index: 2, kind: input, shape index: {}]   ;;  %s1339_s3 = inlined_call_operand.hbm [shape: f32[2,16,64], index: 3, kind: output, shape index: {}]  }
   0x1   :  { %10 = vsyncpa [#allocation3 + $0x1], 0  ;;  %s1187_s12 = smov 0   ;;  %s1189_s13 = smov 0  }
   0x2   :  { %s1191_s14 = smov 0   ;;  %s1193_s15 = smov 0  }
   0x3   :  { %s1195_s16 = smov 0   ;;  %s1197_s17 = smov 0  }
   0x4 LB: > { %s847_s18 = sadd.s32 4294967295, %s1161_s17   ;;  %s848_s19 = sadd.s32 4294967294, %s1161_s17   ;;  %s1161_s17 = sphi %s1197_s17, %s16_s17   ;;  %s1157_s16 = sphi %s1195_s16, %s1346_s16   ;;  %s1153_s15 = sphi %s1193_s15, %s1345_s15   ;;  %s1149_s14 = sphi %s1191_s14, %s1344_s14   ;;  %s1145_s13 = sphi %s1189_s13, %s1343_s13   ;;  %s1141_s12 = sphi %s1187_s12, %s1342_s12  }
   0x5   : > { %s28_s20 = sadd.s32 1, %s1157_s16  ;;  %s107_s21 = sadd.s32 1, %s1149_s14 }
   0x6   : > { %p30_p0 = scmp.ge.s32.totalorder %s28_s20, 2  ;;  %p117_p1 = scmp.ne.s32.totalorder %s1149_s14, %s1145_s13 }
   0x7   : > { %p118_p2 = scmp.eq.s32.totalorder %s847_s18, 1  ;;  %p123_p3 = scmp.ne.s32.totalorder %s1145_s13, %s1141_s12 }
   0x8   : > { %s1348_s20 = smov (%p30_p0, %s28_s20), 0  ;;  %p124_p5 = scmp.eq.s32.totalorder %s848_s19, 1 }
   0x9   : > { %p1227_p4 = por %p118_p2, %p117_p1  ;;  %s102_s23 = ssub.s32 %s1157_s16, %s1348_s20 }
   0xa   : > { %p851_p6 = scmp.ge.s32.totalorder %s1161_s17, 1  ;;  %p105_p7 = scmp.eq.s32.totalorder %s102_s23, 0 }
   0xb   : > { %p1234_p8 = por %p124_p5, %p123_p3  ;;  %p159_p9 = scmp.lt.s32.totalorder %s1161_s17, 3 }
   0xc   : > { %s1240_s25 = scalar_select %p105_p7, %s1149_s14, %s107_s21  }
   0xd   : > { %p160_p10 = pnand %p851_p6, %p159_p9 }
   0xe   : > { %p186_p11 = scmp.lt.s32.totalorder (!%p160_p10), %s1153_s15, 1  ;;  %v194_v0 = vld [vmem:[%s1337_s1] sm:$0xff] (!%p160_p10)  ;;  %v195_v1 = vld [vmem:[%s1337_s1 + $0x8] sm:$0xff] (!%p160_p10)  ;;  %vm212_vm0 = vcmask (!%p160_p10), 220160   ;;  %v1163_v4 = vmov (!%p160_p10), 0   ;;  %vm219_vm1 = vcmask (!%p160_p10), 1042432  }
   0xf   : > { %163 = sbr.rel (%p160_p10) target bundleno = 287 (0x11f), region = 32  ;;  %v214_v2 = vsel (!%p160_p10), %vm212_vm0, %v194_v0, 0  ;;  %v217_v3 = vsel (!%p160_p10), %vm212_vm0, %v195_v1, 0  ;;  %1082 = vset.pattern.permute.xlu0 (!%p160_p10), %v1163_v4  ;;  %v200_v5 = vld [vmem:[%s1338_s2] sm:$0xff] (!%p160_p10)  ;;  %v201_v8 = vld [vmem:[%s1338_s2 + $0x8] sm:$0xff] (!%p160_p10)  ;;  %s183_s18 = sand.u32 (!%p160_p10), 1, %s1145_s13  }
  0x10   : > { %v1253_v6 = vand.u32 (!%p160_p10), 4294901760, %v214_v2  ;;  %v1255_v7 = vand.u32 (!%p160_p10), 4294901760, %v217_v3  ;;  %204 = vperm.xlu0 (!%p160_p10), %1082, %v200_v5   ;;  %s852_s19 = sshll.u32 (!%p160_p10), %s183_s18, 4  ;;  %s861_s26 = sshll.u32 (!%p160_p10), %s1153_s15, 8  ;;  %vm751_vm2 = vcmask (!%p160_p10), 523264  }
  0x11   : > { %s185_s21 = scalar_lea.vmem (!%p160_p10), [#allocation2], %s852_s19  ;;  %s1288_s29 = scalar_lea.hbm (!%p160_p10), %s1339_s3, %s861_s26 }
  0x12   : > { %v1261_v9 = vsub.f32 (!%p160_p10), %v214_v2, %v1253_v6  ;;  %v1264_v10 = vsub.f32 (!%p160_p10), %v217_v3, %v1255_v7  ;;  %s769_s23 = sshll.u32 (!%p160_p10), %s185_s21, 4  ;;  %s1164_s4 = smov (!%p160_p10), [#allocation2]   ;;  %s1283_s23 = int_to_ptr.vmem [resolvable:$true] %s769_s23 }
  0x13   : > { %s1083_s30 = scalar_lea.vmem (!%p160_p10), %s1283_s23, 256 }
  0x14   : > { %v294_v14 = vand.u32 (!%p160_p10), 4294901760, %v1261_v9  ;;  %v304_v15 = vand.u32 (!%p160_p10), 4294901760, %v1264_v10  ;;  %209 = vperm.xlu0 (!%p160_p10), %1082, %v201_v8   ;;  %p1084_p12 = scmp.ne.s32.totalorder (!%p160_p10), %s1283_s23, %s1083_s30 }
  0x16   : > { %s187_s5 = scalar_select %p186_p11, %s1153_s15, 1  ;;  %v295_v21 = vsub.f32 %v1261_v9, %v294_v14  ;;  %939 = vmatprep.mubr.f32.mxu0 %v294_v14  ;;  %v305_v27 = vsub.f32 %v1264_v10, %v304_v15 }
  0x17   : > { %s1290_s15 = scalar_lea.sflag [#allocation3], %s183_s18  ;;  %p1085_p13 = pnand %p1084_p12, %p1227_p4 }
  0x18   : > { %s860_s8 = sshll.u32 %s187_s5, 5  ;;  %v296_v26 = vand.u32 4294901760, %v295_v21  ;;  %v306_v39 = vand.u32 4294901760, %v305_v27  ;;  %s1087_s5 = sshll.u32 %s1164_s4, 4  ;;  %s1088_s5 = int_to_ptr.vmem [resolvable:$false] %s1087_s5 }
  0x19   : > { %s193_s11 = scalar_lea.vmem %s1336_s0, %s860_s8  ;;  %p1086_p0 = pneg %p1085_p13 }
  0x1a   : > { %v196_v11 = vld [vmem:[%s193_s11] sm:$0xff]  ;;  %v197_v12 = vld [vmem:[%s193_s11 + $0x8] sm:$0xff]  ;;  %v198_v13 = vld [vmem:[%s193_s11 + $0x10] sm:$0xff]  ;;  %906 = vmatprep.mubr.f32.mxu1 %v296_v26  ;;  %s1089_s6 = scalar_lea.vmem %s1088_s5, 512  ;;  %p1090_p1 = scmp.lt.s32.totalorder %s1283_s23, %s1088_s5 }
  0x1b   : > { %v224_v16 = vand.u32 4294901760, %v196_v11  ;;  %v227_v17 = vand.u32 4294901760, %v197_v12  ;;  %v199_v18 = vld [vmem:[%s193_s11 + $0x18] sm:$0x7]  ;;  %v230_v19 = vand.u32 4294901760, %v198_v13  ;;  %p1091_p2 = scmp.lt.s32.totalorder %s1089_s6, %s1083_s30 }
  0x1c   : > { %v221_v20 = vsel %vm219_vm1, %v199_v18, 0 }
  0x1d   : > { %v964_v22 = vpack.c.bf16 %v227_v17, %v224_v16  ;;  %v233_v23 = vand.u32 4294901760, %v221_v20  ;;  %v314_v24 = vsub.f32 %v196_v11, %v224_v16  ;;  %v321_v25 = vsub.f32 %v197_v12, %v227_v17  ;;  %p1092_p3 = por %p1091_p2, %p1090_p1 }
  0x1e   : > { %v328_v28 = vsub.f32 %v198_v13, %v230_v19 }
  0x1f   : > { %965 = vmatprep.subr.bf16.mxu1 %v964_v22  ;;  %989 = vmatprep.subr.bf16.mxu0 %v964_v22  ;;  %v968_v29 = vpack.c.bf16 %v233_v23, %v230_v19  ;;  %v315_v30 = vand.u32 4294901760, %v314_v24  ;;  %v322_v31 = vand.u32 4294901760, %v321_v25  ;;  %v335_v32 = vsub.f32 %v221_v20, %v233_v23  ;;  %p1093_p5 = pnand %p1092_p3, %p1086_p0 }
  0x20   : > { %967 = vmatpush3.bf16.msra.mxu1 %v964_v22  ;;  %991 = vmatpush3.bf16.msra.mxu0 %v964_v22  ;;  %v329_v33 = vand.u32 4294901760, %v328_v28  ;;  %v980_v48 = vpack.c.bf16 %v321_v25, %v314_v24 }
  0x21   : > { %969 = vmatprep.subr.bf16.mxu1 %v968_v29  ;;  %993 = vmatprep.subr.bf16.mxu0 %v968_v29  ;;  %v316_v34 = vsub.f32 %v314_v24, %v315_v30  ;;  %v323_v35 = vsub.f32 %v321_v25, %v322_v31  ;;  %v996_v36 = vpack.c.bf16 %v322_v31, %v315_v30  ;;  %v336_v37 = vand.u32 4294901760, %v335_v32 }
  0x22   : > { %v330_v38 = vsub.f32 %v328_v28, %v329_v33  ;;  %v984_v49 = vpack.c.bf16 %v335_v32, %v328_v28 }
  0x23   : > { %v317_v40 = vand.u32 4294901760, %v316_v34  ;;  %v324_v41 = vand.u32 4294901760, %v323_v35  ;;  %v337_v42 = vsub.f32 %v335_v32, %v336_v37  ;;  %v1000_v46 = vpack.c.bf16 %v336_v37, %v329_v33 }
  0x24   : > { %971 = vmatpush3.bf16.msra.mxu1 %v968_v29  ;;  %995 = vmatpush3.bf16.msra.mxu0 %v968_v29  ;;  %v331_v43 = vand.u32 4294901760, %v330_v38 }
  0x25   : > { %v972_v44 = vpack.c.bf16 %v324_v41, %v317_v40  ;;  %997 = vmatprep.subr.bf16.mxu0 %v996_v36  ;;  %v338_v45 = vand.u32 4294901760, %v337_v42 }
  0x27   : > { %907 = vmatmul.mubr.f32.vlgmr.msra.gmra.mrb[0].mxu1 %v306_v39  ;;  %973 = vmatprep.subr.bf16.mxu1 %v972_v44  ;;  %v976_v47 = vpack.c.bf16 %v338_v45, %v331_v43 }
  0x28   : > { %940 = vmatmul.mubr.f32.vlgmr.msra.gmra.mrb[0].mxu0 %v304_v15  ;;  %975 = vmatpush3.bf16.msra.mxu1 %v972_v44 }
  0x29   : > { %999 = vmatpush3.bf16.msra.mxu0 %v996_v36  ;;  %977 = vmatprep.subr.bf16.mxu1 %v976_v47 }
  0x2a   : > { %1001 = vmatprep.subr.bf16.mxu0 %v1000_v46  ;;  %917 = vmatprep.mubr.f32.mxu1 %v1253_v6 }
  0x2b   : > { %950 = vmatprep.mubr.f32.mxu0 %v1253_v6 }
  0x2c   : > { %979 = vmatpush3.bf16.msra.mxu1 %v976_v47 }
  0x2d   : > { %1003 = vmatpush3.bf16.msra.mxu0 %v1000_v46  ;;  %981 = vmatprep.subr.bf16.mxu1 %v980_v48 }
  0x2e   : > { %1005 = vmatprep.subr.bf16.mxu0 %v964_v22 }
  0x2f   : > { %918 = vmatmul.mubr.f32.vlgmr.msra.gmra.mrb[0].mxu1 %v1255_v7 }
  0x30   : > { %951 = vmatmul.mubr.f32.vlgmr.msra.gmra.mrb[0].mxu0 %v1255_v7  ;;  %983 = vmatpush3.bf16.msra.mxu1 %v980_v48 }
  0x31   : > { %1007 = vmatpush3.bf16.msra.mxu0 %v964_v22  ;;  %985 = vmatprep.subr.bf16.mxu1 %v984_v49 }
  0x32   : > { %1009 = vmatprep.subr.bf16.mxu0 %v968_v29  ;;  %928 = vmatprep.mubr.f32.mxu1 %v1261_v9 }
  0x33   : > { %961 = vmatprep.mubr.f32.mxu0 %v1253_v6 }
  0x34   : > { %987 = vmatpush3.bf16.msra.mxu1 %v984_v49 }
  0x35   : > { %1011 = vmatpush3.bf16.msra.mxu0 %v968_v29 }
  0x37   : > { %929 = vmatmul.mubr.f32.vlgmr.msra.gmra.mrb[0].mxu1 %v1264_v10 }
  0x38   : > { %962 = vmatmul.mubr.f32.vlgmr.msra.gmra.mrb[0].mxu0 %v1255_v7 }
  0x8f   : > { %v205_v50 = vpop.permute.xlu0 %204 }
  0x93   : > { %v210_v51 = vpop.permute.xlu0 %209 }
 0x10a   : > { %v930_v52 = vpop.f32.mrb[0].mxu1 }
 0x10b   : > { %v1012_v53 = vadd.f32 %v930_v52, %v210_v51  ;;  %v963_v54 = vpop.f32.mrb[0].mxu0  ;;  %v485_v55 = vpop.f32.mrb[1].mxu1 }
 0x10c   : > { %v1014_v56 = vadd.f32 %v485_v55, %v205_v50  ;;  %v741_v57 = vpop.f32.mrb[1].mxu0 }
 0x10d   : > { %v1013_v58 = vadd.f32 %v1012_v53, %v963_v54 }
 0x10e   : > { %v1015_v59 = vadd.f32 %v1014_v56, %v741_v57 }
 0x10f   : > { %753 = vst.msk [vmem:[%s185_s21 + $0x8] sm:$0xff] %vm751_vm2, %v1013_v58 }
 0x110   : > { %752 = vst.msk [vmem:[%s185_s21] sm:$0xff] %vm751_vm2, %v1015_v59 }
 0x111   : > { %1096 = shalt.err (!%p1093_p5)
}
 0x112   : > { %s1097_s7 = scalar_lea.hbm %s1288_s29, 256  ;;  %s1101_s10 = scalar_lea.hbm %s1339_s3, 512 }
 0x113   : > { %p1098_p6 = scmp.ne.s32.totalorder %s1288_s29, %s1097_s7  ;;  %p1102_p10 = scmp.lt.u32.totalorder %s1288_s29, %s1339_s3 }
 0x114   : > { %p1103_p11 = scmp.lt.u32.totalorder %s1101_s10, %s1097_s7  ;;  %p1105_p13 = scmp.lt.u32.totalorder %s1097_s7, %s1288_s29 }
 0x115   : > { %p1099_p7 = pnand %p1098_p6, %p1227_p4 }
 0x116   : > { %p1104_p12 = por %p1103_p11, %p1102_p10 }
 0x117   : > { %p1100_p9 = pneg %p1099_p7 }
 0x118   : > { %p1106_p0 = por %p1105_p13, %p1104_p12 }
 0x11a   : > { %p1107_p1 = pnand %p1106_p0, %p1100_p9 }
 0x11c   : > { %1110 = shalt.err (!%p1107_p1)
}
 0x11d   : > { %s1165_s19 = smov 128   ;;  %s1166_s21 = smov 8  }
 0x11e   : > { %1024 = dma.vmem_to_hbm [thread:$0]  (%p1227_p4), %s1283_s23, 256, %s1288_s29, %s1290_s15, %s1165_s19, %s1165_s19, %s1166_s21  }
 0x11f PF: > { %p1030_p2 = scmp.ge.s32.totalorder %s1161_s17, 2  ;;  %s784_s26 = sand.u32 1, %s1141_s12  }
 0x120   : > { %s785_s27 = scalar_lea.sflag [#allocation3], %s784_s26 }
 0x121   : > { %p1027_p3 = pnand %p1030_p2, %p1234_p8 }
 0x123   : > { %1136 = dma.done.wait (!%p1027_p3), %s785_s27, 256  }
 0x124   : > { %1138 = vsyncadd (!%p1027_p3), %s785_s27, 4294967040  ;;  %s16_s17 = sadd.s32 1, %s1161_s17   ;;  %s1342_s12 = smov %s1145_s13 }
 0x125   : > { %p13_p5 = scmp.ge.s32.totalorder %s16_s17, 4   ;;  %s1343_s13 = smov %s1149_s14 }
 0x126   : > { %s1344_s14 = smov %s1240_s25  ;;  %s1345_s15 = smov %s1157_s16 }
 0x127   : > { %s1346_s16 = smov %s1348_s20  ;;  %15 = sbr.rel (!%p13_p5) target bundleno = 4 (0x4), region = 67 }
 0x12e   :  { %790 = vsyncpa [#allocation3], 1 }
 0x12f   :  { %792 = vsyncpa [#allocation3 + $0x1], 1 }

</bundles_post_ra>
